<compile_context>
chip_gen: v5e
topology: v5e:2x2
jax: 0.10.0
libtpu: 0.0.40
codegen_flags: <defaults>
</compile_context>

<pallas_src>
import functools

import jax
import jax.numpy as jnp
from jax.experimental import pallas as pl
from jax.experimental.pallas import tpu as pltpu

LN_EPS = 1e-5  # torch.nn.LayerNorm default


def _round_up(a: int, b: int) -> int:
    return (a + b - 1) // b * b


def _vmem_capacity_bytes() -> int:
    """Per-core VMEM capacity; conservative v7x-safe fallback if unavailable."""
    try:
        cap = getattr(pltpu.get_tpu_info(), "vmem_capacity_bytes", None)
        if cap:
            return int(cap)
    except Exception:
        pass
    return 64 * 1024 * 1024


def _feature_projection_kernel(x_ref, gamma_ref, beta_ref, w_ref, b_ref, o_ref,
                               *, valid_in: int, pad_in: int):
    # x_ref: (TM, IN_p) f32, gamma/beta: (1, IN_p), w: (IN_p, TN) bf16,
    # b: (1, TN), o: (TM, TN)
    x = x_ref[...].astype(jnp.float32)

    # --- LayerNorm, f32 statistics. Pad lanes of x are zero, so the plain sums
    # only need a scalar correction for the variance (no iota mask passes). ---
    inv_n = 1.0 / float(valid_in)
    mean = jnp.sum(x, axis=-1, keepdims=True) * inv_n
    centered = x - mean
    sq = jnp.sum(centered * centered, axis=-1, keepdims=True)
    if pad_in:
        # pad lanes contribute pad_in * mean^2 to sum(centered^2); remove it.
        sq = sq - float(pad_in) * (mean * mean)
    var = sq * inv_n
    inv = jax.lax.rsqrt(var + LN_EPS)
    # gamma/beta are zero on pad lanes -> x_norm pad lanes are exactly zero.
    x_norm = (centered * inv) * gamma_ref[...].astype(jnp.float32) \
        + beta_ref[...].astype(jnp.float32)

    # --- Linear projection: bf16 operands on the MXU, f32 accumulation ---
    y = jnp.dot(x_norm.astype(jnp.bfloat16), w_ref[...],
                preferred_element_type=jnp.float32)
    y = y + b_ref[...].astype(jnp.float32)

    # --- Dropout: identity in eval mode ---
    o_ref[...] = y.astype(o_ref.dtype)


@functools.partial(jax.jit, static_argnames=("block_rows", "block_cols"))
def feature_projection(x, gamma, beta, w, b, *, block_rows=1024, block_cols=512):
    """x: [batch, frame, in_features] -> [batch, frame, out_features]."""
    batch, frame, in_features = x.shape
    out_features = w.shape[1]
    rows = batch * frame

    in_p = _round_up(in_features, 128)
    out_p128 = _round_up(out_features, 128)

    # --- generation-aware VMEM budget (v5e/v6e: 128 MiB, v7x: 64 MiB/TC) ---
    vmem_cap = _vmem_capacity_bytes()
    vmem_limit = min(int(vmem_cap * 0.8), 100 * 1024 * 1024)
    budget = min(int(vmem_cap * 0.6), 80 * 1024 * 1024)

    # --- N tiling: keep the whole bf16 weight VMEM-resident when it fits ---
    if 2 * in_p * out_p128 * 2 <= budget // 4:      # double-buffered bf16 weight
        tn = out_p128
    else:
        tn = min(_round_up(block_cols, 128), out_p128)
    out_p = _round_up(out_p128, tn)                 # tn divides out_p: no partial N block
    n_tiles = out_p // tn

    # --- row tile: multiple of 8, sized against the budget incl. temporaries ---
    x_bytes = x.dtype.itemsize
    out_bytes = x.dtype.itemsize
    fixed = 2 * in_p * tn * 2                                        # bf16 weight (x2 bufs)
    fixed += 2 * (2 * in_p * gamma.dtype.itemsize + tn * b.dtype.itemsize)
    per_row = (2 * in_p * x_bytes                                    # x block (x2 bufs)
               + 2 * tn * out_bytes                                  # out block (x2 bufs)
               + in_p * (4 + 4 + 2)                                  # f32 x, centered/x_norm, bf16 copy
               + tn * 4)                                             # f32 accumulator
    tm_cap = max(8, (max(budget - fixed, 0) // per_row) // 8 * 8)
    tm = max(8, min(_round_up(block_rows, 8), tm_cap, _round_up(rows, 8)))
    row_tiles = pl.cdiv(rows, tm)

    # --- operand prep: pad feature dims only when not lane-aligned ---
    x2d = x.reshape(rows, in_features)
    if in_p != in_features:
        x2d = jnp.zeros((rows, in_p), x.dtype).at[:, :in_features].set(x2d)
        gamma_p = jnp.zeros((1, in_p), gamma.dtype).at[:, :in_features].set(gamma)
        beta_p = jnp.zeros((1, in_p), beta.dtype).at[:, :in_features].set(beta)
    else:
        gamma_p, beta_p = gamma, beta
    if (in_p, out_p) != (in_features, out_features):
        w_p = jnp.zeros((in_p, out_p), w.dtype).at[:in_features, :out_features].set(w)
        b_p = jnp.zeros((1, out_p), b.dtype).at[:, :out_features].set(b)
    else:
        w_p, b_p = w, b
    w_p = w_p.astype(jnp.bfloat16)    # pre-cast: half the weight DMA bytes, no in-kernel cast

    kernel = functools.partial(_feature_projection_kernel,
                               valid_in=in_features, pad_in=in_p - in_features)

    if n_tiles == 1:
        # 1-D grid over row tiles; weight/params have constant block indices so
        # they are DMA'd into VMEM once and stay resident for all row tiles.
        grid = (row_tiles,)
        in_specs = [
            pl.BlockSpec((tm, in_p), lambda i: (i, 0)),
            pl.BlockSpec((1, in_p), lambda i: (0, 0)),
            pl.BlockSpec((1, in_p), lambda i: (0, 0)),
            pl.BlockSpec((in_p, out_p), lambda i: (0, 0)),
            pl.BlockSpec((1, out_p), lambda i: (0, 0)),
        ]
        out_specs = pl.BlockSpec((tm, out_p), lambda i: (i, 0))
        dim_sems = ("parallel",)
    else:
        # Weight-varying axis outermost: the (in_p, tn) weight tile is only
        # re-DMA'd when j changes, not on every row step.
        grid = (n_tiles, row_tiles)
        in_specs = [
            pl.BlockSpec((tm, in_p), lambda j, i: (i, 0)),
            pl.BlockSpec((1, in_p), lambda j, i: (0, 0)),
            pl.BlockSpec((1, in_p), lambda j, i: (0, 0)),
            pl.BlockSpec((in_p, tn), lambda j, i: (0, j)),
            pl.BlockSpec((1, tn), lambda j, i: (0, j)),
        ]
        out_specs = pl.BlockSpec((tm, tn), lambda j, i: (i, j))
        dim_sems = ("parallel", "parallel")

    out2d = pl.pallas_call(
        kernel,
        out_shape=jax.ShapeDtypeStruct((rows, out_p), x.dtype),
        grid_spec=pltpu.PrefetchScalarGridSpec(
            num_scalar_prefetch=0,
            grid=grid,
            in_specs=in_specs,
            out_specs=out_specs,
        ),
        compiler_params=pltpu.CompilerParams(
            dimension_semantics=dim_sems,
            vmem_limit_bytes=vmem_limit,
        ),
    )(x2d, gamma_p, beta_p, w_p, b_p)

    if out_p != out_features:
        out2d = out2d[:, :out_features]
    return out2d.reshape(batch, frame, out_features)


def reference_feature_projection(x, gamma, beta, w, b):
    xf = x.astype(jnp.float32)
    mean = jnp.mean(xf, axis=-1, keepdims=True)
    var = jnp.mean((xf - mean) ** 2, axis=-1, keepdims=True)
    xn = (xf - mean) * jax.lax.rsqrt(var + LN_EPS)
    xn = xn * gamma[0] + beta[0]
    return (xn @ w.astype(jnp.float32) + b[0]).astype(x.dtype)


if __name__ == "__main__":
    # Module config (synthetic, deterministic init)
    in_features = 32
    out_features = 64
    dropout = 0.1  # inference mode -> identity
    batch, frame = 2, 8

    key = jax.random.PRNGKey(0)
    kx, kw, kb, kg, kbeta = jax.random.split(key, 5)

    x = jax.random.normal(kx, (batch, frame, in_features), dtype=jnp.float32)

    # nn.LayerNorm init: weight=1, bias=0 (small deterministic noise to exercise scale/shift)
    gamma = (jnp.ones((1, in_features), jnp.float32)
             + 0.01 * jax.random.normal(kg, (1, in_features)))
    beta = 0.01 * jax.random.normal(kbeta, (1, in_features))

    # nn.Linear init: U(-1/sqrt(in), 1/sqrt(in)); weight stored transposed as [in, out]
    bound = 1.0 / (in_features ** 0.5)
    w = jax.random.uniform(kw, (in_features, out_features), jnp.float32, -bound, bound)
    b = jax.random.uniform(kb, (1, out_features), jnp.float32, -bound, bound)

    out = feature_projection(x, gamma, beta, w, b)
    out = jax.block_until_ready(out)

    ref = reference_feature_projection(x, gamma, beta, w, b)
    assert out.shape == (batch, frame, out_features)
    # bf16 MXU matmul (f32 accumulation) vs. all-f32 reference -> relaxed tolerance.
    assert jnp.allclose(out, ref, atol=3e-2, rtol=3e-2), "mismatch vs reference"

    print("KERNEL_OK")
</pallas_src>

<mosaic_0001>
module attributes {stable_mosaic.version = 11 : i64} {
  func.func @_feature_projection_kernel(%arg0: i32, %arg1: memref<16x128xf32, #tpu.memory_space<vmem>>, %arg2: memref<1x128xf32, #tpu.memory_space<vmem>>, %arg3: memref<1x128xf32, #tpu.memory_space<vmem>>, %arg4: memref<128x128xbf16, #tpu.memory_space<vmem>>, %arg5: memref<1x128xf32, #tpu.memory_space<vmem>>, %arg6: memref<16x128xf32, #tpu.memory_space<vmem>>) attributes {dimension_semantics = [#tpu.dimension_semantics<parallel>], iteration_bounds = array<i64: 1>, scalar_prefetch = 0 : i64, scratch_operands = 0 : i64, tpu.core_type = #tpu.core_type<tc>, window_params = [{transform_indices = @transform_0, window_bounds = array<i64: 16, 128>}, {pipeline_mode = #tpu.pipeline_mode<synchronous>, transform_indices = @transform_1, window_bounds = array<i64: 1, 128>}, {pipeline_mode = #tpu.pipeline_mode<synchronous>, transform_indices = @transform_2, window_bounds = array<i64: 1, 128>}, {pipeline_mode = #tpu.pipeline_mode<synchronous>, transform_indices = @transform_3, window_bounds = array<i64: 128, 128>}, {pipeline_mode = #tpu.pipeline_mode<synchronous>, transform_indices = @transform_4, window_bounds = array<i64: 1, 128>}, {transform_indices = @transform_5, window_bounds = array<i64: 16, 128>}]} {
    %c0 = arith.constant 0 : index
    %c0_0 = arith.constant 0 : index
    %0 = vector.load %arg1[%c0, %c0_0] : memref<16x128xf32, #tpu.memory_space<vmem>>, vector<16x128xf32>
    %cst = arith.constant dense<0.000000e+00> : vector<16xf32>
    %1 = vector.multi_reduction <add>, %0, %cst [1] : vector<16x128xf32> to vector<16xf32>
    %2 = vector.shape_cast %1 : vector<16xf32> to vector<16x1xf32>
    %cst_1 = arith.constant 3.125000e-02 : f32
    %3 = vector.broadcast %cst_1 : f32 to vector<16x1xf32>
    %4 = arith.mulf %2, %3 : vector<16x1xf32>
    %5 = vector.broadcast %4 : vector<16x1xf32> to vector<16x128xf32>
    %6 = arith.subf %0, %5 : vector<16x128xf32>
    %7 = arith.mulf %6, %6 : vector<16x128xf32>
    %cst_2 = arith.constant dense<0.000000e+00> : vector<16xf32>
    %8 = vector.multi_reduction <add>, %7, %cst_2 [1] : vector<16x128xf32> to vector<16xf32>
    %9 = vector.shape_cast %8 : vector<16xf32> to vector<16x1xf32>
    %10 = arith.mulf %4, %4 : vector<16x1xf32>
    %cst_3 = arith.constant 9.600000e+01 : f32
    %11 = vector.broadcast %cst_3 : f32 to vector<16x1xf32>
    %12 = arith.mulf %11, %10 : vector<16x1xf32>
    %13 = arith.subf %9, %12 : vector<16x1xf32>
    %cst_4 = arith.constant 3.125000e-02 : f32
    %14 = vector.broadcast %cst_4 : f32 to vector<16x1xf32>
    %15 = arith.mulf %13, %14 : vector<16x1xf32>
    %cst_5 = arith.constant 9.99999974E-6 : f32
    %16 = vector.broadcast %cst_5 : f32 to vector<16x1xf32>
    %17 = arith.addf %15, %16 : vector<16x1xf32>
    %18 = math.rsqrt %17 : vector<16x1xf32>
    %19 = vector.broadcast %18 : vector<16x1xf32> to vector<16x128xf32>
    %20 = arith.mulf %6, %19 : vector<16x128xf32>
    %c0_6 = arith.constant 0 : index
    %c0_7 = arith.constant 0 : index
    %21 = vector.load %arg2[%c0_6, %c0_7] : memref<1x128xf32, #tpu.memory_space<vmem>>, vector<1x128xf32>
    %22 = vector.broadcast %21 : vector<1x128xf32> to vector<16x128xf32>
    %23 = arith.mulf %20, %22 : vector<16x128xf32>
    %c0_8 = arith.constant 0 : index
    %c0_9 = arith.constant 0 : index
    %24 = vector.load %arg3[%c0_8, %c0_9] : memref<1x128xf32, #tpu.memory_space<vmem>>, vector<1x128xf32>
    %25 = vector.broadcast %24 : vector<1x128xf32> to vector<16x128xf32>
    %26 = arith.addf %23, %25 : vector<16x128xf32>
    %27 = arith.truncf %26 : vector<16x128xf32> to vector<16x128xbf16>
    %c0_10 = arith.constant 0 : index
    %c0_11 = arith.constant 0 : index
    %28 = vector.load %arg4[%c0_10, %c0_11] : memref<128x128xbf16, #tpu.memory_space<vmem>>, vector<128x128xbf16>
    %cst_12 = arith.constant dense<0.000000e+00> : vector<16x128xf32>
    %29 = tpu.matmul %27, %28, %cst_12 {dimension_numbers = #tpu.dot_dimension_numbers<[1], [0], [0], [1], [0, 0, 1, 1], [], []>} : vector<16x128xbf16>, vector<128x128xbf16>, vector<16x128xf32> -> vector<16x128xf32>
    %c0_13 = arith.constant 0 : index
    %c0_14 = arith.constant 0 : index
    %30 = vector.load %arg5[%c0_13, %c0_14] : memref<1x128xf32, #tpu.memory_space<vmem>>, vector<1x128xf32>
    %31 = vector.broadcast %30 : vector<1x128xf32> to vector<16x128xf32>
    %32 = arith.addf %29, %31 : vector<16x128xf32>
    %c0_15 = arith.constant 0 : index
    %c0_16 = arith.constant 0 : index
    %33 = vector.load %arg6[%c0_15, %c0_16] : memref<16x128xf32, #tpu.memory_space<vmem>>, vector<16x128xf32>
    tpu.vector_store %arg6[%c0_15, %c0_16], %32 {strides = array<i32>} : memref<16x128xf32, #tpu.memory_space<vmem>>, vector<16x128xf32>,
    return
  }
  func.func @transform_0(%arg0: i32) -> (i32, i32) {
    %c0_i32 = arith.constant 0 : i32
    %c0_i32_0 = arith.constant 0 : i32
    return %arg0, %c0_i32 : i32, i32
  }
  func.func @transform_1(%arg0: i32) -> (i32, i32) {
    %c0_i32 = arith.constant 0 : i32
    %c0_i32_0 = arith.constant 0 : i32
    %c0_i32_1 = arith.constant 0 : i32
    return %c0_i32, %c0_i32_0 : i32, i32
  }
  func.func @transform_2(%arg0: i32) -> (i32, i32) {
    %c0_i32 = arith.constant 0 : i32
    %c0_i32_0 = arith.constant 0 : i32
    %c0_i32_1 = arith.constant 0 : i32
    return %c0_i32, %c0_i32_0 : i32, i32
  }
  func.func @transform_3(%arg0: i32) -> (i32, i32) {
    %c0_i32 = arith.constant 0 : i32
    %c0_i32_0 = arith.constant 0 : i32
    %c0_i32_1 = arith.constant 0 : i32
    return %c0_i32, %c0_i32_0 : i32, i32
  }
  func.func @transform_4(%arg0: i32) -> (i32, i32) {
    %c0_i32 = arith.constant 0 : i32
    %c0_i32_0 = arith.constant 0 : i32
    %c0_i32_1 = arith.constant 0 : i32
    return %c0_i32, %c0_i32_0 : i32, i32
  }
  func.func @transform_5(%arg0: i32) -> (i32, i32) {
    %c0_i32 = arith.constant 0 : i32
    %c0_i32_0 = arith.constant 0 : i32
    return %arg0, %c0_i32 : i32, i32
  }
}

</mosaic_0001>

<bundles_post_ra>
// kernel: feature_projection.1
= control target key start
LH: loop header
LB: loop body
LE: loop exit
PB: predicated region body
PF: predicated region fallthrough
CT: control target
= control target key end

     0   :  { %s291_s0 = inlined_call_operand.vmem [shape: f32[16,128], index: 0, kind: input, shape index: {}]   ;;  %s292_s1 = inlined_call_operand.vmem [shape: f32[1,128], index: 1, kind: input, shape index: {}]   ;;  %s293_s2 = inlined_call_operand.vmem [shape: f32[1,128], index: 2, kind: input, shape index: {}]   ;;  %s294_s4 = inlined_call_operand.vmem [shape: f32[1,128], index: 4, kind: input, shape index: {}]   ;;  %s295_s3 = inlined_call_operand.vmem [shape: bf16[128,128], index: 3, kind: input, shape index: {}]   ;;  %s296_s5 = inlined_call_operand.vmem [shape: f32[16,128], index: 5, kind: output, shape index: {}]  }
   0x1   :  { %v20_v0 = vld [vmem:[%s291_s0] sm:$0xff]  ;;  %v21_v1 = vld [vmem:[%s291_s0 + $0x8] sm:$0xff]  ;;  %v208_v10 = vld [vmem:[%s295_s3 + $0x38] sm:$0xff] }
   0x2   :  { %22 = vadd.xlane.f32.xlu0 %v20_v0  ;;  %149 = vmatpush.bf16.msra.mxu0 %v208_v10  ;;  %v207_v11 = vld [vmem:[%s295_s3 + $0x30] sm:$0xff]  ;;  %v206_v12 = vld [vmem:[%s295_s3 + $0x28] sm:$0xff]  ;;  %v205_v13 = vld [vmem:[%s295_s3 + $0x20] sm:$0xff] }
   0x3   :  { %v204_v14 = vld [vmem:[%s295_s3 + $0x18] sm:$0xff]  ;;  %v203_v16 = vld [vmem:[%s295_s3 + $0x10] sm:$0xff]  ;;  %v202_v17 = vld [vmem:[%s295_s3 + $0x8] sm:$0xff] }
   0x4   :  { %v201_v21 = vld [vmem:[%s295_s3] sm:$0xff] }
   0x5   :  { %v209_v43 = vld [vmem:[%s292_s1] ss:$0 sm:$0xff] }
   0x6   :  { %150 = vmatpush.bf16.msra.mxu0 %v207_v11  ;;  %v210_v48 = vld [vmem:[%s293_s2] ss:$0 sm:$0xff] }
   0x7   :  { %v211_v53 = vld [vmem:[%s294_s4] ss:$0 sm:$0xff] }
   0xa   :  { %24 = vadd.xlane.f32.xlu0 %v21_v1  ;;  %151 = vmatpush.bf16.msra.mxu0 %v206_v12 }
   0xe   :  { %152 = vmatpush.bf16.msra.mxu0 %v205_v13 }
  0x12   :  { %153 = vmatpush.bf16.msra.mxu0 %v204_v14 }
  0x16   :  { %154 = vmatpush.bf16.msra.mxu0 %v203_v16 }
  0x1a   :  { %155 = vmatpush.bf16.msra.mxu0 %v202_v17 }
  0x1e   :  { %156 = vmatpush.bf16.msra.mxu0 %v201_v21 }
  0x75   :  { %v23_v2 = vpop.xlane.xlu0 %22 }
  0x76   :  { %v26_v3 = vmul.f32 0.03125, %v23_v2 }
  0x78   :  { %v28_v4 = vsub.f32 %v20_v0, %v26_v3  ;;  %v36_v15 = vmul.f32 %v26_v3, %v26_v3 }
  0x7a   :  { %v30_v5 = vmul.f32 %v28_v4, %v28_v4  ;;  %v38_v18 = vmul.f32 96.0, %v36_v15 }
  0x7c   :  { %32 = vadd.xlane.f32.xlu1 %v30_v5 }
  0x7d   :  { %v25_v6 = vpop.xlane.xlu0 %24 }
  0x7e   :  { %v27_v7 = vmul.f32 0.03125, %v25_v6 }
  0x80   :  { %v29_v8 = vsub.f32 %v21_v1, %v27_v7  ;;  %v37_v22 = vmul.f32 %v27_v7, %v27_v7 }
  0x82   :  { %v31_v9 = vmul.f32 %v29_v8, %v29_v8  ;;  %v39_v25 = vmul.f32 96.0, %v37_v22 }
  0x84   :  { %34 = vadd.xlane.f32.xlu1 %v31_v9 }
  0xef   :  { %v33_v19 = vpop.xlane.xlu1 %32 }
  0xf0   :  { %v40_v20 = vsub.f32 %v33_v19, %v38_v18 }
  0xf2   :  { %v42_v23 = vmul.f32 0.03125, %v40_v20 }
  0xf4   :  { %v44_v24 = vadd.f32 1e-05, %v42_v23 }
  0xf6   :  { %212 = vrsqrt.f32 %v44_v24  ;;  %vm52_vm1 = vweird.f32 %v44_v24 }
  0xf7   :  { %v35_v26 = vpop.xlane.xlu1 %34 }
  0xf8   :  { %v41_v27 = vsub.f32 %v35_v26, %v39_v25 }
  0xfa   :  { %v43_v28 = vmul.f32 0.03125, %v41_v27 }
  0xfc   :  { %v213_v29 = vpop.eup %212  ;;  %v45_v30 = vadd.f32 1e-05, %v43_v28 }
  0xfd   :  { %v47_v31 = vmul.f32 %v213_v29, %v44_v24  ;;  %vm53_vm0 = vweird.f32 %v213_v29 }
  0xfe   :  { %214 = vrsqrt.f32 %v45_v30  ;;  %vm54_vm2 = vmor %vm52_vm1, %vm53_vm0  ;;  %vm62_vm4 = vweird.f32 %v45_v30 }
  0xff   :  { %v48_v32 = vmul.f32 %v213_v29, %v47_v31 }
 0x101   :  { %v49_v33 = vmul.f32 0.5, %v48_v32 }
 0x103   :  { %v50_v34 = vsub.f32 1.5, %v49_v33 }
 0x104   :  { %v215_v35 = vpop.eup %214 }
 0x105   :  { %v51_v36 = vmul.f32 %v213_v29, %v50_v34  ;;  %v57_v37 = vmul.f32 %v215_v35, %v45_v30  ;;  %vm63_vm3 = vweird.f32 %v215_v35 }
 0x106   :  { %vm64_vm5 = vmor %vm62_vm4, %vm63_vm3 }
 0x107   :  { %v58_v38 = vmul.f32 %v215_v35, %v57_v37  ;;  %v55_v40 = vsel %vm54_vm2, %v213_v29, %v51_v36 }
 0x108   :  { %v66_v42 = vmul.f32 %v55_v40, %v28_v4 }
 0x109   :  { %v59_v39 = vmul.f32 0.5, %v58_v38 }
 0x10a   :  { %v72_v47 = vmul.f32 %v209_v43, %v66_v42 }
 0x10b   :  { %v60_v41 = vsub.f32 1.5, %v59_v39 }
 0x10c   :  { %v78_v50 = vadd.f32 %v210_v48, %v72_v47 }
 0x10d   :  { %v61_v44 = vmul.f32 %v215_v35, %v60_v41 }
 0x10f   :  { %v65_v45 = vsel %vm64_vm5, %v215_v35, %v61_v44 }
 0x110   :  { %v67_v46 = vmul.f32 %v65_v45, %v29_v8 }
 0x112   :  { %v73_v49 = vmul.f32 %v209_v43, %v67_v46 }
 0x114   :  { %v79_v51 = vadd.f32 %v210_v48, %v73_v49 }
 0x116   :  { %v80_v52 = vpack.c.bf16 %v79_v51, %v78_v50 }
 0x118   :  { %157 = vmatmul.bf16.vlgmr.msra.gmra.mxu0 %v80_v52 }
 0x195   :  { %v158_v54 = vpop.f32.mrf.mxu0 }
 0x196   :  { %v159_v55 = vadd.f32 %v211_v53, %v158_v54 }
 0x198   :  { %163 = vst [vmem:[%s296_s5] sm:$0xff] %v159_v55 }
 0x19d   :  { %v160_v56 = vpop.f32.mrf.mxu0 }
 0x19e   :  { %v161_v57 = vadd.f32 %v211_v53, %v160_v56 }
 0x1a0   :  { %164 = vst [vmem:[%s296_s5 + $0x8] sm:$0xff] %v161_v57 }

</bundles_post_ra>
